<compile_context>
chip_gen: v5e
topology: v5e:2x2
jax: 0.10.0
libtpu: 0.0.40
codegen_flags: <defaults>
</compile_context>

<pallas_src>
import jax
import jax.numpy as jnp
from jax.experimental import pallas as pl
from jax.experimental.pallas import tpu as pltpu


def _round_up(a, b):
    return ((a + b - 1) // b) * b


def _sublane_multiple(dtype):
    # Minimum sublane tile per dtype width: 4B -> 8, 2B -> 16, 1B -> 32.
    return {4: 8, 2: 16, 1: 32}.get(jnp.dtype(dtype).itemsize, 8)


def _chip_budgets():
    """Return (target block bytes, scoped vmem limit) sized per chip."""
    try:
        vmem_cap = int(pltpu.get_tpu_info().vmem_capacity_bytes)
    except Exception:
        vmem_cap = 64 << 20  # conservative default if the query is unavailable
    if vmem_cap >= (96 << 20):   # v5e / v6e class: 128 MiB physical VMEM
        return 8 << 20, 56 << 20
    return 4 << 20, 28 << 20     # v7x class: 64 MiB physical VMEM


_TINY_BYTES = 1 << 20       # below this a fused XLA multiply beats a kernel
_MIN_SPLIT_BYTES = 2 << 20  # only force a >= 2-wide grid (megacore) above this


def _pfde_kernel(lpde_ref, x_ref, out_ref):
    # LPDE block broadcasts over the leading (batch) dim of the x/out block.
    out_ref[...] = x_ref[...] * lpde_ref[...]


def _pfde_flat(x2, lpde2, N, F, itemsize, sub_mult, target_bytes, vmem_limit,
               total_bytes, donate_x):
    """Lane-dense (N, L*D) slab layout (general case)."""
    padded_f = _round_up(F, 128)
    row_bytes = padded_f * itemsize

    # --- batch tile: dtype-aware sublane multiple, padding-aware budget -----
    if N <= sub_mult:
        tn = N                                   # full-dim block is always legal
    else:
        tn = (target_bytes // row_bytes) // sub_mult * sub_mult
        tn = max(sub_mult, tn)
        if tn >= N:
            tn = N
    padded_tn = _round_up(tn, sub_mult)

    # --- feature tile: keep the full lane-dense row unless the PADDED block
    #     would blow the per-block budget -------------------------------------
    if padded_tn * row_bytes <= target_bytes:
        tf = F
    else:
        tf = (target_bytes // (padded_tn * itemsize)) // 128 * 128
        tf = max(128, tf)
        if tf >= F:
            tf = F

    nb = pl.cdiv(N, tn)
    fb = pl.cdiv(F, tf)

    # --- make sure v7x megacore has >= 2 blocks to shard when it is worth it --
    if nb * fb == 1 and total_bytes >= _MIN_SPLIT_BYTES:
        if N > sub_mult:
            tn = min(tn, _round_up(pl.cdiv(N, 2), sub_mult))
            nb = pl.cdiv(N, tn)
        elif F >= 2 * 128:
            tf = _round_up(pl.cdiv(F, 2), 128)
            fb = pl.cdiv(F, tf)

    if fb == 1:
        # LPDE row resident for the whole grid; batch axis leads for megacore.
        grid = (nb,)
        in_specs = [
            pl.BlockSpec((1, tf), lambda i: (0, 0)),
            pl.BlockSpec((tn, tf), lambda i: (i, 0)),
        ]
        out_specs = pl.BlockSpec((tn, tf), lambda i: (i, 0))
        dim_sem = ("parallel",)
    else:
        # Feature axis OUTER so each LPDE tile is fetched once and stays
        # resident across the inner batch loop (no redundant LPDE DMA traffic).
        grid = (fb, nb)
        in_specs = [
            pl.BlockSpec((1, tf), lambda j, i: (0, j)),
            pl.BlockSpec((tn, tf), lambda j, i: (i, j)),
        ]
        out_specs = pl.BlockSpec((tn, tf), lambda j, i: (i, j))
        dim_sem = ("parallel", "parallel")

    return pl.pallas_call(
        _pfde_kernel,
        out_shape=jax.ShapeDtypeStruct((N, F), x2.dtype),
        grid_spec=pltpu.PrefetchScalarGridSpec(
            num_scalar_prefetch=0,
            grid=grid,
            in_specs=in_specs,
            out_specs=out_specs,
        ),
        compiler_params=pltpu.CompilerParams(
            dimension_semantics=dim_sem,
            vmem_limit_bytes=vmem_limit,
        ),
        input_output_aliases=({1: 0} if donate_x else {}),
    )(lpde2, x2)


def _pfde_3d(x, lpde, N, L, D, itemsize, sub_mult, target_bytes, vmem_limit,
             total_bytes, donate_x):
    """Small-N layout: (N, tl, D) blocks with batch as a leading (untiled) dim.

    Used when D is already a multiple of 128, so tiles stay lane-dense and the
    tiny batch does not waste 8/16/32-row sublane padding on every block.
    """
    row_bytes = N * D * itemsize  # bytes per patch-row of one block
    tl = (target_bytes // row_bytes) // sub_mult * sub_mult
    tl = max(sub_mult, tl)
    if tl >= L:
        tl = L
    lb = pl.cdiv(L, tl)

    # Give v7x megacore at least 2 blocks when the work is big enough.
    if lb == 1 and total_bytes >= _MIN_SPLIT_BYTES and L > sub_mult:
        tl = min(tl, _round_up(pl.cdiv(L, 2), sub_mult))
        lb = pl.cdiv(L, tl)

    return pl.pallas_call(
        _pfde_kernel,
        out_shape=jax.ShapeDtypeStruct((N, L, D), x.dtype),
        grid_spec=pltpu.PrefetchScalarGridSpec(
            num_scalar_prefetch=0,
            grid=(lb,),
            in_specs=[
                pl.BlockSpec((tl, D), lambda j: (j, 0)),
                pl.BlockSpec((N, tl, D), lambda j: (0, j, 0)),
            ],
            out_specs=pl.BlockSpec((N, tl, D), lambda j: (0, j, 0)),
        ),
        compiler_params=pltpu.CompilerParams(
            dimension_semantics=("parallel",),
            vmem_limit_bytes=vmem_limit,
        ),
        input_output_aliases=({1: 0} if donate_x else {}),
    )(lpde, x)


def pfde_forward(x, lpde, *, force_pallas=False, donate_x=False):
    """x: (N, L, D), lpde: (L, D) -> (N, L, D) broadcast elementwise product."""
    N, L, D = x.shape
    assert lpde.shape == (L, D), (lpde.shape, (L, D))

    # Avoid implicit dtype promotion / extra VPU casts inside the kernel.
    lpde = lpde.astype(x.dtype)

    itemsize = jnp.dtype(x.dtype).itemsize
    total_bytes = N * L * D * itemsize
    if (not force_pallas) and total_bytes < _TINY_BYTES:
        # Tiny (or fusable-by-XLA) case: a standalone kernel must round-trip
        # the whole array through HBM; let XLA fuse the multiply instead.
        return lpde[None, :, :] * x

    sub_mult = _sublane_multiple(x.dtype)
    target_bytes, vmem_limit = _chip_budgets()

    # Small batch + lane-friendly embed_dim: use the 3-D layout so the batch
    # dim does not burn sublane padding in every block.
    use_3d = (
        N < sub_mult
        and D % 128 == 0
        and L >= sub_mult
        and N * D * itemsize * sub_mult <= target_bytes
    )
    if use_3d:
        return _pfde_3d(x, lpde, N, L, D, itemsize, sub_mult, target_bytes,
                        vmem_limit, total_bytes, donate_x)

    # General case: flatten to a lane-dense (N, L*D) slab so stores are full
    # unmasked vst and the LPDE row broadcasts over sublanes.
    F = L * D
    x2 = x.reshape(N, F)
    lpde2 = lpde.reshape(1, F)
    out2 = _pfde_flat(x2, lpde2, N, F, itemsize, sub_mult, target_bytes,
                      vmem_limit, total_bytes, donate_x)
    return out2.reshape(N, L, D)


class PFDE:
    """JAX/Pallas port of the PyTorch PFDE module."""

    def __init__(self, patch_num, embed_dim, dtype=jnp.float32):
        self.patch_num = patch_num
        self.embed_dim = embed_dim
        # nn.Parameter(torch.ones(patch_num, embed_dim)) equivalent init.
        self.LPDE = jnp.ones((patch_num, embed_dim), dtype=dtype)

    def __call__(self, x, *, force_pallas=False, donate_x=False):
        return pfde_forward(x, self.LPDE, force_pallas=force_pallas,
                            donate_x=donate_x)


if __name__ == "__main__":
    key = jax.random.PRNGKey(0)

    # --- Test 1: small shapes from the module spec (flattened lane-dense path)
    N, L, D = 2, 8, 32
    k1, k2 = jax.random.split(key)
    x = jax.random.normal(k1, (N, L, D), dtype=jnp.float32)
    module = PFDE(patch_num=L, embed_dim=D)
    module.LPDE = (
        jnp.arange(L * D, dtype=jnp.float32).reshape(L, D) / (L * D) + 0.5
    )
    out = module(x, force_pallas=True)       # force the Pallas path (input is tiny)
    out = jax.block_until_ready(out)
    ref = module.LPDE[None, :, :] * x
    assert out.shape == (N, L, D)
    assert jnp.allclose(out, ref, atol=1e-6, rtol=1e-6)

    # --- Test 2: small-batch, lane-friendly embed_dim (3-D block path)
    N2, L2, D2 = 2, 16, 128
    x2 = jax.random.normal(k2, (N2, L2, D2), dtype=jnp.float32)
    module2 = PFDE(patch_num=L2, embed_dim=D2)
    module2.LPDE = (
        jnp.arange(L2 * D2, dtype=jnp.float32).reshape(L2, D2) / (L2 * D2) - 0.25
    )
    out2 = module2(x2, force_pallas=True)
    out2 = jax.block_until_ready(out2)
    ref2 = module2.LPDE[None, :, :] * x2
    assert out2.shape == (N2, L2, D2)
    assert jnp.allclose(out2, ref2, atol=1e-6, rtol=1e-6)

    print("KERNEL_OK")
</pallas_src>

<mosaic_0001>
module attributes {stable_mosaic.version = 11 : i64} {
  func.func @_pfde_kernel(%arg0: i32, %arg1: memref<1x256xf32, #tpu.memory_space<vmem>>, %arg2: memref<2x256xf32, #tpu.memory_space<vmem>>, %arg3: memref<2x256xf32, #tpu.memory_space<vmem>>) attributes {dimension_semantics = [#tpu.dimension_semantics<parallel>], iteration_bounds = array<i64: 1>, scalar_prefetch = 0 : i64, scratch_operands = 0 : i64, tpu.core_type = #tpu.core_type<tc>, window_params = [{pipeline_mode = #tpu.pipeline_mode<synchronous>, transform_indices = @transform_0, window_bounds = array<i64: 1, 256>}, {transform_indices = @transform_1, window_bounds = array<i64: 2, 256>}, {transform_indices = @transform_2, window_bounds = array<i64: 2, 256>}]} {
    %c0 = arith.constant 0 : index
    %c0_0 = arith.constant 0 : index
    %0 = vector.load %arg2[%c0, %c0_0] : memref<2x256xf32, #tpu.memory_space<vmem>>, vector<2x256xf32>
    %c0_1 = arith.constant 0 : index
    %c0_2 = arith.constant 0 : index
    %1 = vector.load %arg1[%c0_1, %c0_2] : memref<1x256xf32, #tpu.memory_space<vmem>>, vector<1x256xf32>
    %2 = vector.broadcast %1 : vector<1x256xf32> to vector<2x256xf32>
    %3 = arith.mulf %0, %2 : vector<2x256xf32>
    %c0_3 = arith.constant 0 : index
    %c0_4 = arith.constant 0 : index
    %4 = vector.load %arg3[%c0_3, %c0_4] : memref<2x256xf32, #tpu.memory_space<vmem>>, vector<2x256xf32>
    tpu.vector_store %arg3[%c0_3, %c0_4], %3 {strides = array<i32>} : memref<2x256xf32, #tpu.memory_space<vmem>>, vector<2x256xf32>,
    return
  }
  func.func @transform_0(%arg0: i32) -> (i32, i32) {
    %c0_i32 = arith.constant 0 : i32
    %c0_i32_0 = arith.constant 0 : i32
    %c0_i32_1 = arith.constant 0 : i32
    return %c0_i32, %c0_i32_0 : i32, i32
  }
  func.func @transform_1(%arg0: i32) -> (i32, i32) {
    %c0_i32 = arith.constant 0 : i32
    %c0_i32_0 = arith.constant 0 : i32
    return %arg0, %c0_i32 : i32, i32
  }
  func.func @transform_2(%arg0: i32) -> (i32, i32) {
    %c0_i32 = arith.constant 0 : i32
    %c0_i32_0 = arith.constant 0 : i32
    return %arg0, %c0_i32 : i32, i32
  }
}

</mosaic_0001>

<bundles_post_ra>
// kernel: tpu_custom_call.1
= control target key start
LH: loop header
LB: loop body
LE: loop exit
PB: predicated region body
PF: predicated region fallthrough
CT: control target
= control target key end

     0   :  { %7 = vsyncpa [#allocation3], 0  ;;  %s177_s0 = inlined_call_operand.hbm [shape: f32[1,256], index: 0, kind: input, shape index: {}]   ;;  %s178_s1 = inlined_call_operand.hbm [shape: f32[2,256], index: 1, kind: input, shape index: {}]   ;;  %s179_s2 = inlined_call_operand.hbm [shape: f32[2,256], index: 2, kind: output, shape index: {}]  }
   0x1   :  { %8 = vsyncpa [#allocation6], 0 }
   0x2   :  { %9 = vsyncpa [#allocation4], 0  ;;  %s15_s11 = sshll.u32 %s177_s0, 4  ;;  %s150_s12 = smov [#allocation2]   ;;  %s16_s11 = int_to_ptr.hbm [resolvable:$true] %s15_s11 }
   0x3   :  { %s17_s13 = sshll.u32 %s150_s12, 4  ;;  %s26_s16 = sshll.u32 %s178_s1, 4  ;;  %s18_s13 = int_to_ptr.vmem [resolvable:$true] %s17_s13  ;;  %s27_s16 = int_to_ptr.hbm [resolvable:$true] %s26_s16 }
   0x4   :  { %20 = dma.hbm_to_vmem [thread:$0]  %s16_s11, 32, %s18_s13, [#allocation3]  }
   0x5   :  { %s151_s17 = smov [#allocation5]  }
   0x6   :  { %s28_s18 = sshll.u32 %s151_s17, 4  ;;  %s29_s18 = int_to_ptr.vmem [resolvable:$true] %s28_s18 }
   0x7   :  { %31 = dma.hbm_to_vmem [thread:$0]  %s27_s16, 64, %s29_s18, [#allocation6]  }
   0x8   :  { %144 = dma.done.wait [#allocation3], 32  }
   0x9   :  { %145 = vsyncadd [#allocation3], 4294967264 }
   0xa   :  { %146 = dma.done.wait [#allocation6], 64  }
   0xb   :  { %147 = vsyncadd [#allocation6], 4294967232  ;;  %v41_v0 = vld [vmem:[#allocation2] sm:$0x3]  ;;  %vm46_vm0 = vcmask 1041408   ;;  %s152_s0 = smov [#allocation7]  }
   0xc   :  { %v43_v1 = vperm.slane %v41_v0, 0  ;;  %v44_v2 = vperm.slane %v41_v0, 1  ;;  %v40_v3 = vld [vmem:[#allocation5] sm:$0xf]  ;;  %s56_s19 = sshll.u32 %s152_s0, 4  ;;  %s58_s21 = sshll.u32 %s179_s2, 4  ;;  %s57_s19 = int_to_ptr.vmem [resolvable:$true] %s56_s19  ;;  %s59_s21 = int_to_ptr.hbm [resolvable:$true] %s58_s21 }
   0xe   :  { %v45_v4 = vrot.slane %v44_v2, 6 }
  0x10   :  { %v47_v5 = vsel %vm46_vm0, %v43_v1, %v45_v4 }
  0x11   :  { %v49_v6 = vmul.f32 %v47_v5, %v40_v3 }
  0x13   :  { %50 = vst [vmem:[#allocation7] sm:$0xf] %v49_v6 }
  0x14   :  { %61 = dma.vmem_to_hbm [thread:$0]  %s57_s19, 64, %s59_s21, [#allocation4]  }
  0x15   :  { %148 = dma.done.wait [#allocation4], 64  }
  0x16   :  { %149 = vsyncadd [#allocation4], 4294967232 }
  0x17   :  { %66 = vsyncpa [#allocation3], 1 }
  0x18   :  { %67 = vsyncpa [#allocation6], 1 }
  0x19   :  { %68 = vsyncpa [#allocation4], 1 }

</bundles_post_ra>
